<compile_context>
chip_gen: v7x
topology: tpu7x:2x2x1
jax: 0.10.0
libtpu: 0.0.40
codegen_flags: <defaults>
</compile_context>

<pallas_src>
import jax
import jax.numpy as jnp
from jax.experimental import pallas as pl
from jax.experimental.pallas import tpu as pltpu


def _se_kernel(x_ref, w1t_ref, w2t_ref, o_ref):
    # x_ref / o_ref: (Bblk, C, HWp) tile; w1t_ref: (C, Cr); w2t_ref: (Cr, C).
    x = x_ref[...]                                           # input-dtype tile

    # Squeeze: spatial sum (padded lanes are zero), accumulated in f32.
    # The 1/(H*W) of the mean is pre-folded into w1t in the wrapper.
    y = jnp.sum(x, axis=-1, dtype=jnp.float32)               # (Bblk, C)

    # Excite: fc1 (no bias) + ReLU, fc2 (no bias) + sigmoid, batched over Bblk.
    h = jnp.dot(y, w1t_ref[...], preferred_element_type=jnp.float32)   # (Bblk, Cr)
    h = jnp.maximum(h, 0.0)
    s = jnp.dot(h, w2t_ref[...], preferred_element_type=jnp.float32)   # (Bblk, C)
    s = jax.nn.sigmoid(s)                                    # exp on EUP slot

    # Scale: broadcast per-channel gate over spatial; multiply in input dtype.
    o_ref[...] = (x * s.astype(x.dtype)[:, :, None]).astype(o_ref.dtype)


def se_layer(x, w1, w2):
    """x: (B, C, H, W); w1: (C//r, C); w2: (C, C//r) (nn.Linear layout, no bias)."""
    B, C, H, W = x.shape
    HW = H * W
    Cr = w1.shape[0]
    dtype_bytes = jnp.dtype(x.dtype).itemsize

    # Lane-dense last dim: flatten spatial, zero-pad to a multiple of 128.
    HWp = pl.cdiv(HW, 128) * 128
    xr = x.reshape(B, C, HW)
    if HWp != HW:
        xr = jnp.pad(xr, ((0, 0), (0, 0), (0, HWp - HW)))

    # Pick Bblk so each x/out block is ~4 MiB, but keep >= 2 grid steps when
    # B >= 2 so both v7x TensorCores get work on the "parallel" axis.
    per_batch_bytes = C * HWp * dtype_bytes
    bblk = max(1, (4 << 20) // per_batch_bytes)
    if B >= 2:
        bblk = min(bblk, pl.cdiv(B, 2))
    bblk = int(min(bblk, B))
    # TODO(synk): if a single batch slice (C*HWp) ever exceeds ~12 MiB, split
    # the spatial axis into a second grid dim (pool pass + scale pass).

    # Pad batch to a multiple of Bblk (padded rows are zero; sliced off below).
    Bp = pl.cdiv(B, bblk) * bblk
    if Bp != B:
        xr = jnp.pad(xr, ((0, Bp - B), (0, 0), (0, 0)))

    # Weights in matmul-friendly orientation; fold 1/HW of the mean into w1.
    w1t = (w1.astype(jnp.float32) / jnp.float32(HW)).T       # (C, Cr)
    w2t = w2.astype(jnp.float32).T                           # (Cr, C)

    grid = (Bp // bblk,)

    # VMEM budget: double-buffered input + output blocks + weights + headroom.
    block_bytes = bblk * C * HWp * dtype_bytes
    w_bytes = 2 * (C * Cr) * 4
    vmem_needed = 4 * block_bytes + 4 * w_bytes + (2 << 20)
    vmem_limit = int(min(max(vmem_needed, 16 << 20), 48 << 20))

    cost = pl.CostEstimate(
        flops=2 * Bp * C * HWp + 4 * Bp * C * Cr,
        transcendentals=Bp * C,
        bytes_accessed=2 * Bp * C * HWp * dtype_bytes,
    )

    out = pl.pallas_call(
        _se_kernel,
        out_shape=jax.ShapeDtypeStruct((Bp, C, HWp), x.dtype),
        grid_spec=pltpu.PrefetchScalarGridSpec(
            num_scalar_prefetch=0,
            grid=grid,
            in_specs=[
                pl.BlockSpec((bblk, C, HWp), lambda b: (b, 0, 0)),
                pl.BlockSpec((C, Cr), lambda b: (0, 0)),
                pl.BlockSpec((Cr, C), lambda b: (0, 0)),
            ],
            out_specs=pl.BlockSpec((bblk, C, HWp), lambda b: (b, 0, 0)),
        ),
        compiler_params=pltpu.CompilerParams(
            dimension_semantics=("parallel",),
            vmem_limit_bytes=vmem_limit,
        ),
        cost_estimate=cost,
    )(xr, w1t, w2t)

    # Strip padding only when it was actually added (avoid an extra HBM copy).
    if Bp != B or HWp != HW:
        out = out[:B, :, :HW]
    return out.reshape(B, C, H, W)


def se_layer_ref(x, w1, w2):
    """Pure-JAX reference mirroring the PyTorch module."""
    y = jnp.mean(x.astype(jnp.float32), axis=(2, 3))         # (B, C)
    y = jnp.maximum(y @ w1.astype(jnp.float32).T, 0.0)       # (B, C//r)
    y = jax.nn.sigmoid(y @ w2.astype(jnp.float32).T)         # (B, C)
    return (x.astype(jnp.float32) * y[:, :, None, None]).astype(x.dtype)


if __name__ == "__main__":
    # Small shapes consistent with the module: SELayer(channel=32, reduction=16)
    B, C, H, W = 2, 32, 16, 16
    reduction = 16
    Cr = C // reduction

    key = jax.random.PRNGKey(0)
    kx, k1, k2 = jax.random.split(key, 3)

    x = jax.random.normal(kx, (B, C, H, W), dtype=jnp.float32)
    # nn.Linear weight convention: (out_features, in_features), bias=False.
    w1 = jax.random.normal(k1, (Cr, C), dtype=jnp.float32) * (1.0 / jnp.sqrt(C))
    w2 = jax.random.normal(k2, (C, Cr), dtype=jnp.float32) * (1.0 / jnp.sqrt(Cr))

    out = jax.block_until_ready(se_layer(x, w1, w2))
    ref = jax.block_until_ready(se_layer_ref(x, w1, w2))

    assert out.shape == (B, C, H, W)
    assert jnp.allclose(out, ref, atol=1e-5, rtol=1e-5)
    print("KERNEL_OK")
</pallas_src>

<mosaic_0001>
module attributes {stable_mosaic.version = 11 : i64} {
  func.func @_se_kernel(%arg0: i32, %arg1: memref<1x32x256xf32, #tpu.memory_space<vmem>>, %arg2: memref<32x2xf32, #tpu.memory_space<vmem>>, %arg3: memref<2x32xf32, #tpu.memory_space<vmem>>, %arg4: memref<1x32x256xf32, #tpu.memory_space<vmem>>) attributes {dimension_semantics = [#tpu.dimension_semantics<parallel>], iteration_bounds = array<i64: 2>, scalar_prefetch = 0 : i64, scratch_operands = 0 : i64, tpu.core_type = #tpu.core_type<tc>, window_params = [{transform_indices = @transform_0, window_bounds = array<i64: 1, 32, 256>}, {pipeline_mode = #tpu.pipeline_mode<synchronous>, transform_indices = @transform_1, window_bounds = array<i64: 32, 2>}, {pipeline_mode = #tpu.pipeline_mode<synchronous>, transform_indices = @transform_2, window_bounds = array<i64: 2, 32>}, {transform_indices = @transform_3, window_bounds = array<i64: 1, 32, 256>}]} {
    %c0 = arith.constant 0 : index
    %c0_0 = arith.constant 0 : index
    %c0_1 = arith.constant 0 : index
    %0 = vector.load %arg1[%c0, %c0_0, %c0_1] : memref<1x32x256xf32, #tpu.memory_space<vmem>>, vector<1x32x256xf32>
    %cst = arith.constant dense<0.000000e+00> : vector<1x32xf32>
    %1 = vector.multi_reduction <add>, %0, %cst [2] : vector<1x32x256xf32> to vector<1x32xf32>
    %c0_2 = arith.constant 0 : index
    %c0_3 = arith.constant 0 : index
    %2 = vector.load %arg2[%c0_2, %c0_3] : memref<32x2xf32, #tpu.memory_space<vmem>>, vector<32x2xf32>
    %cst_4 = arith.constant dense<0.000000e+00> : vector<1x2xf32>
    %3 = tpu.matmul %1, %2, %cst_4 {dimension_numbers = #tpu.dot_dimension_numbers<[1], [0], [0], [1], [0, 0, 1, 1], [], []>} : vector<1x32xf32>, vector<32x2xf32>, vector<1x2xf32> -> vector<1x2xf32>
    %cst_5 = arith.constant 0.000000e+00 : f32
    %4 = vector.broadcast %cst_5 : f32 to vector<1x2xf32>
    %5 = arith.maximumf %3, %4 : vector<1x2xf32>
    %c0_6 = arith.constant 0 : index
    %c0_7 = arith.constant 0 : index
    %6 = vector.load %arg3[%c0_6, %c0_7] : memref<2x32xf32, #tpu.memory_space<vmem>>, vector<2x32xf32>
    %cst_8 = arith.constant dense<0.000000e+00> : vector<1x32xf32>
    %7 = tpu.matmul %5, %6, %cst_8 {dimension_numbers = #tpu.dot_dimension_numbers<[1], [0], [0], [1], [0, 0, 1, 1], [], []>} : vector<1x2xf32>, vector<2x32xf32>, vector<1x32xf32> -> vector<1x32xf32>
    %8 = arith.negf %7 : vector<1x32xf32>
    %9 = math.exp %8 : vector<1x32xf32>
    %cst_9 = arith.constant 1.000000e+00 : f32
    %10 = vector.broadcast %cst_9 : f32 to vector<1x32xf32>
    %11 = arith.addf %10, %9 : vector<1x32xf32>
    %12 = arith.divf %10, %11 : vector<1x32xf32>
    %13 = vector.shape_cast %12 : vector<1x32xf32> to vector<1x32x1xf32>
    %14 = vector.broadcast %13 : vector<1x32x1xf32> to vector<1x32x256xf32>
    %15 = arith.mulf %0, %14 : vector<1x32x256xf32>
    %c0_10 = arith.constant 0 : index
    %c0_11 = arith.constant 0 : index
    %c0_12 = arith.constant 0 : index
    %16 = vector.load %arg4[%c0_10, %c0_11, %c0_12] : memref<1x32x256xf32, #tpu.memory_space<vmem>>, vector<1x32x256xf32>
    tpu.vector_store %arg4[%c0_10, %c0_11, %c0_12], %15 {strides = array<i32>} : memref<1x32x256xf32, #tpu.memory_space<vmem>>, vector<1x32x256xf32>,
    return
  }
  func.func @transform_0(%arg0: i32) -> (i32, i32, i32) {
    %c0_i32 = arith.constant 0 : i32
    %c0_i32_0 = arith.constant 0 : i32
    %c0_i32_1 = arith.constant 0 : i32
    return %arg0, %c0_i32, %c0_i32_0 : i32, i32, i32
  }
  func.func @transform_1(%arg0: i32) -> (i32, i32) {
    %c0_i32 = arith.constant 0 : i32
    %c0_i32_0 = arith.constant 0 : i32
    %c0_i32_1 = arith.constant 0 : i32
    return %c0_i32, %c0_i32_0 : i32, i32
  }
  func.func @transform_2(%arg0: i32) -> (i32, i32) {
    %c0_i32 = arith.constant 0 : i32
    %c0_i32_0 = arith.constant 0 : i32
    %c0_i32_1 = arith.constant 0 : i32
    return %c0_i32, %c0_i32_0 : i32, i32
  }
  func.func @transform_3(%arg0: i32) -> (i32, i32, i32) {
    %c0_i32 = arith.constant 0 : i32
    %c0_i32_0 = arith.constant 0 : i32
    %c0_i32_1 = arith.constant 0 : i32
    return %arg0, %c0_i32, %c0_i32_0 : i32, i32, i32
  }
}

</mosaic_0001>

<bundles_post_ra>
// kernel: tpu_custom_call.1
= control target key start
LH: loop header
LB: loop body
LE: loop exit
PB: predicated region body
PF: predicated region fallthrough
CT: control target
= control target key end

     0   :  { %8 = vsyncpa [#allocation3], 0  ;;  %s971_s0 = inlined_call_operand.hbm [shape: f32[2,32,256], index: 0, kind: input, shape index: {}]   ;;  %s972_s1 = inlined_call_operand.vmem [shape: f32[32,2], index: 1, kind: input, shape index: {}]   ;;  %s973_s2 = inlined_call_operand.vmem [shape: f32[2,32], index: 2, kind: input, shape index: {}]   ;;  %s974_s3 = inlined_call_operand.hbm [shape: f32[2,32,256], index: 3, kind: output, shape index: {}]  }
   0x1   :  { %10 = vsyncpa [#allocation3 + $0x1], 0 }
   0x2   :  { %11 = vsyncpa [#allocation4], 0 }
   0x3   :  { %13 = vsyncpa [#allocation4 + $0x1], 0  ;;  %s758_s12 = smov 0   ;;  %s760_s13 = smov 0  }
   0x4   :  { %s762_s14 = smov 0   ;;  %s764_s15 = smov 0  }
   0x5 LB: > { %s779_s16 = sadd.s32 4294967295, %s727_s15   ;;  %s525_s17 = sadd.s32 4294967294, %s727_s15   ;;  %s727_s15 = sphi %s764_s15, %s987_s15   ;;  %s723_s14 = sphi %s762_s14, %s986_s14   ;;  %s719_s13 = sphi %s760_s13, %s985_s13   ;;  %s715_s12 = sphi %s758_s12, %s984_s12  }
   0x6   : > { %s783_s18 = sadd.s32 1, %s727_s15   ;;  %s26_s19 = sadd.s32 1, %s723_s14 }
   0x7   : > { %s23_s20 = ssub.s32 %s727_s15, %s783_s18  ;;  %p33_p0 = scmp.ne.s32.totalorder %s723_s14, %s719_s13 }
   0x8   : > { %p24_p1 = scmp.eq.s32.totalorder %s23_s20, 0  ;;  %p34_p2 = scmp.eq.s32.totalorder %s727_s15, 0 }
   0x9   : > { %p39_p3 = scmp.ne.s32.totalorder %s719_s13, %s715_s12  ;;  %p40_p4 = scmp.eq.s32.totalorder %s779_s16, 0 }
   0xa   : > { %s795_s21 = scalar_select %p24_p1, %s723_s14, %s26_s19  }
   0xb   : > { %p797_p5 = por %p34_p2, %p33_p0  ;;  %p801_p6 = por %p40_p4, %p39_p3 }
   0xc   : > { %p105_p7 = scmp.eq.s32.totalorder %s779_s16, 1  ;;  %p111_p8 = scmp.eq.s32.totalorder %s525_s17, 1 }
   0xd   : > { %p586_p10 = scmp.lt.s32.totalorder %s727_s15, 2  ;;  %s137_s26 = sand.u32 1, %s723_s14  }
   0xe   : > { %p808_p11 = por %p105_p7, %p33_p0  ;;  %p812_p12 = por %p111_p8, %p39_p3 }
   0xf   : > { %s543_s27 = sshll.u32 %s727_s15, 10  ;;  %s528_s28 = sshll.u32 %s137_s26, 6 }
  0x10   : > { %s978_s24 = scalar_select %p808_p11, 1, 0 }
  0x11   : > { %s979_s25 = scalar_select %p812_p12, 1, 0 }
  0x12   : > { %s821_s4 = scalar_lea.hbm %s971_s0, %s543_s27  ;;  %s141_s5 = scalar_lea.vmem [#allocation2], %s528_s28 }
  0x13   : > { %s148_s6 = sshll.u32 %s141_s5, 4  ;;  %p825_p13 = pnand %p586_p10, %p797_p5  ;;  %s829_s6 = int_to_ptr.vmem [resolvable:$true] %s148_s6 }
  0x14   : > { %s831_s8 = scalar_lea.sflag [#allocation3], %s137_s26  ;;  %s631_s9 = scalar_lea.hbm %s821_s4, 1024 }
  0x15   : > { %p632_p0 = scmp.ne.s32.totalorder %s821_s4, %s631_s9  ;;  %p633_p1 = pneg %p825_p13 }
  0x16   : > { %s636_s17 = scalar_lea.hbm %s971_s0, 2048  ;;  %p637_p4 = scmp.lt.u32.totalorder %s821_s4, %s971_s0 }
  0x17   : > { %p634_p2 = pnand %p633_p1, %p632_p0  ;;  %p638_p5 = scmp.lt.u32.totalorder %s636_s17, %s631_s9 }
  0x18   : > { %p640_p8 = scmp.lt.u32.totalorder %s631_s9, %s821_s4 }
  0x19   : > { %p635_p3 = pneg %p634_p2  ;;  %p639_p7 = por %p638_p5, %p637_p4 }
  0x1b   : > { %p641_p10 = por %p640_p8, %p639_p7 }
  0x1d   : > { %p642_p9 = pnand %p641_p10, %p635_p3 }
  0x1f   : > { %645 = shalt.err (!%p642_p9)
}
  0x20   : > { %s646_s22 = scalar_lea.vmem %s829_s6, 1024  ;;  %s729_s26 = smov [#allocation2]  }
  0x21   : > { %p647_p0 = scmp.ne.s32.totalorder %s829_s6, %s646_s22  ;;  %s651_s27 = sshll.u32 %s729_s26, 4  ;;  %s652_s27 = int_to_ptr.vmem [resolvable:$false] %s651_s27 }
  0x22   : > { %s653_s28 = scalar_lea.vmem %s652_s27, 2048  ;;  %p654_p11 = scmp.lt.s32.totalorder %s829_s6, %s652_s27 }
  0x23   : > { %p649_p2 = pnand %p647_p0, %p633_p1  ;;  %p655_p4 = scmp.lt.s32.totalorder %s653_s28, %s646_s22 }
  0x25   : > { %p650_p12 = pneg %p649_p2  ;;  %p656_p5 = por %p655_p4, %p654_p11 }
  0x27   : > { %p657_p7 = pnand %p656_p5, %p650_p12 }
  0x29   : > { %660 = shalt.err (!%p657_p7)
}
  0x2a   : > { %s730_s29 = smov 256   ;;  %s731_s30 = smov 16  }
  0x2b   : > { %581 = dma.hbm_to_vmem [thread:$0]  (!%p825_p13), %s821_s4, 1024, %s829_s6, %s831_s8, %s730_s29, %s730_s29, %s731_s30  }
  0x2c   : > { %p531_p9 = scmp.ge.s32.totalorder %s727_s15, 1  ;;  %p156_p1 = scmp.lt.s32.totalorder %s727_s15, 3 }
  0x2e   : > { %p157_p3 = pnand %p531_p9, %p156_p1 }
  0x2f   : > { %s862_s5 = sand.u32 (!%p157_p3), 1, %s719_s13  }
  0x30   : > { %160 = sbr.rel (%p157_p3) target bundleno = 804 (0x324), region = 32  ;;  %s532_s9 = sshll.u32 (!%p157_p3), %s862_s5, 6 }
  0x31   : > { %s163_s10 = scalar_lea.sflag (!%p157_p3), [#allocation3], %s862_s5  ;;  %s166_s11 = scalar_lea.vmem (!%p157_p3), [#allocation2], %s532_s9 }
  0x37   : > { %706 = dma.done.wait (%p801_p6), %s163_s10, 1024  }
  0x38   : > { %708 = vsyncadd (%p801_p6), %s163_s10, 4294966272  ;;  %v872_v0 = vld [vmem:[%s166_s11] sm:$0xff]  ;;  %v874_v1 = vld [vmem:[%s166_s11 + $0x8] sm:$0xff]  ;;  %v732_v15 = vmov 0.0|0.0   ;;  %vm733_vm0 = vmmov 0   ;;  %v734_v19 = vmov 0.0   ;;  %v217_v20 = vlaneseq }
  0x39   : > { %v876_v2 = vld [vmem:[%s166_s11 + $0x20] sm:$0xff]  ;;  %v197_v3 = vadd.f32 %v874_v1, %v872_v0  ;;  %v880_v4 = vld [vmem:[%s166_s11 + $0x28] sm:$0xff]  ;;  %v882_v5 = vld [vmem:[%s166_s11 + $0x10] sm:$0xff]  ;;  %568 = vmatprep.subr.bf16.mxu0 %v732_v15  ;;  %560 = vmatprep.mubr.msk.f32.mxu0 %vm733_vm0, %v734_v19  ;;  %vm228_vm1 = vcmask 130112   ;;  %vm235_vm2 = vcmask 195712   ;;  %vm242_vm3 = vcmask 261312  }
  0x3a   : > { %v884_v6 = vld [vmem:[%s166_s11 + $0x18] sm:$0xff]  ;;  %v203_v7 = vadd.f32 %v880_v4, %v876_v2  ;;  %v888_v8 = vld [vmem:[%s166_s11 + $0x30] sm:$0xff]  ;;  %v209_v12 = vld [vmem:[%s972_s1] sm:$0xff]  ;;  %563 = vmatprep.subr.mxu1 %v734_v19  ;;  %565 = vmatprep.mubr.msk.f32.mxu1 %vm733_vm0, %v734_v19  ;;  %v218_v21 = vand.u32 127, %v217_v20  ;;  %v220_v22 = vshrl.u32 %v217_v20, 7  ;;  %vm244_vm4 = vcmask 261120  }
  0x3b   : > { %v890_v9 = vld [vmem:[%s166_s11 + $0x38] sm:$0xff]  ;;  %198 = vadd.xlane.f32.xlu0 %v197_v3  ;;  %v200_v10 = vadd.f32 %v884_v6, %v882_v5  ;;  %v210_v13 = vld [vmem:[%s972_s1 + $0x8] sm:$0xff]  ;;  %v211_v16 = vld [vmem:[%s972_s1 + $0x10] sm:$0xff]  ;;  %vm323_vm5 = vcmask 1041408   ;;  %vm319_vm6 = vcmask 15360   ;;  %s188_s27 = scalar_lea.vmem [#allocation5], %s532_s9 }
  0x3c   : > { %204 = vadd.xlane.f32.xlu1 %v203_v7  ;;  %v206_v11 = vadd.f32 %v890_v9, %v888_v8  ;;  %v569_v14 = vpack.c.bf16 %v210_v13, %v209_v12  ;;  %v212_v17 = vld [vmem:[%s972_s1 + $0x18] sm:$0xff]  ;;  %v223_v23 = vadd.s32 4294967288, %v218_v21  ;;  %v230_v24 = vadd.s32 4294967280, %v218_v21  ;;  %v318_v41 = vld [vmem:[%s973_s2] sm:$0x3]  ;;  %s452_s28 = sshll.u32 %s188_s27, 4  ;;  %s920_s28 = int_to_ptr.vmem [resolvable:$true] %s452_s28 }
  0x3d   : > { %v572_v18 = vpack.c.bf16 %v212_v17, %v211_v16  ;;  %v237_v25 = vadd.s32 4294967272, %v218_v21  ;;  %v221_v27 = vsub.s32 %v218_v21, %v220_v22  ;;  %564 = vmatpush3.msk.msra.mxu1 %vm323_vm5, %v318_v41  ;;  %v405_v50 = vsub.s32 0, %v220_v22  ;;  %s544_s29 = sshll.u32 %s779_s16, 10  ;;  %s439_s16 = scalar_lea.sflag [#allocation4], %s862_s5 }
  0x3e   : > { %570 = vmatpush3.bf16.msra.mxu0 %v569_v14  ;;  %v226_v29 = vsub.s32 %v223_v23, %v220_v22  ;;  %v233_v30 = vsub.s32 %v230_v24, %v220_v22  ;;  %s925_s10 = scalar_lea.hbm %s974_s3, %s544_s29  ;;  %s661_s11 = scalar_lea.vmem %s920_s28, 1024 }
  0x3f   : > { %201 = vadd.xlane.f32.xlu0 %v200_v10  ;;  %571 = vmatprep.subr.bf16.mxu0 %v732_v15  ;;  %v240_v31 = vsub.s32 %v237_v25, %v220_v22  ;;  %p662_p6 = scmp.ne.s32.totalorder %s920_s28, %s661_s11  ;;  %p981_p11 = scmp.ne.s32.totalorder %s978_s24, 0 }
  0x40   : > { %207 = vadd.xlane.f32.xlu1 %v206_v11  ;;  %s735_s23 = smov [#allocation5]  }
  0x41   : > { %p663_p12 = pnand %p662_p6, %p981_p11  ;;  %s665_s4 = sshll.u32 %s735_s23, 4  ;;  %s666_s4 = int_to_ptr.vmem [resolvable:$false] %s665_s4 }
  0x42   : > { %573 = vmatpush3.bf16.msra.mxu0 %v572_v18  ;;  %s667_s6 = scalar_lea.vmem %s666_s4, 2048  ;;  %p668_p8 = scmp.lt.s32.totalorder %s920_s28, %s666_s4 }
  0x43   : > { %p664_p13 = pneg %p663_p12  ;;  %p669_p10 = scmp.lt.s32.totalorder %s667_s6, %s661_s11 }
  0x45   : > { %p670_p0 = por %p669_p10, %p668_p8 }
  0x47   : > { %p671_p2 = pnand %p670_p0, %p664_p13 }
  0xc8   : > { %v199_v26 = vpop.xlane.xlu0 %198 }
  0xc9   : > { %v205_v28 = vpop.xlane.xlu1 %204  ;;  %v222_v33 = vrot.slane %v199_v26, %v221_v27 }
  0xca   : > { %v234_v36 = vrot.slane %v205_v28, %v233_v30 }
  0xcc   : > { %v202_v32 = vpop.xlane.xlu0 %201 }
  0xcd   : > { %v227_v34 = vrot.slane %v202_v32, %v226_v29  ;;  %v208_v35 = vpop.xlane.xlu1 %207 }
  0xce   : > { %v241_v37 = vrot.slane %v208_v35, %v240_v31 }
  0xcf   : > { %v229_v38 = vsel %vm228_vm1, %v227_v34, %v222_v33 }
  0xd0   : > { %v236_v39 = vsel %vm235_vm2, %v234_v36, %v229_v38 }
  0xd1   : > { %v243_v40 = vsel %vm242_vm3, %v241_v37, %v236_v39 }
  0xd2   : > { %561 = vmatmul.mubr.msk.f32.vlgmr.msra.gmra.mrb[0].mxu0 %vm244_vm4, %v243_v40 }
 0x1a5   : > { %v313_v42 = vpop.f32.mrb[0].mxu0 }
 0x1a6   : > { %v317_v43 = vmax.f32 %v313_v42, 0.0  ;;  %v562_v44 = vpop.f32.mrb[1].mxu0 }
 0x1a8   : > { %566 = vmatmul.mubr.msk.f32.vlgmr.msra.gmra.mrb[0].mxu1 %vm319_vm6, %v317_v43 }
 0x27b   : > { %v393_v45 = vpop.f32.mrb[0].mxu1 }
 0x27c   : > { %v537_v46 = vmul.f32 -1.442695, %v393_v45  ;;  %v567_v47 = vpop.f32.mrb[1].mxu1 }
 0x27e   : > { %627 = vpow2.f32 %v537_v46 }
 0x288   : > { %v628_v48 = vpop.eup %627 }
 0x289   : > { %v400_v49 = vadd.f32 1.0, %v628_v48 }
 0x28b   : > { %629 = vrcp.f32 %v400_v49 }
 0x295   : > { %v630_v51 = vpop.eup %629 }
 0x296   : > { %v406_v52 = vrot.slane %v630_v51, %v405_v50 }
 0x298   : > { %412 = vbcast.lane.b32.xlu1 %v406_v52, 264  ;;  %408 = vbcast.lane.b32.xlu0 %v406_v52, 256 }
 0x29c   : > { %416 = vbcast.lane.b32.xlu1 %v406_v52, 272 }
 0x2a0   : > { %420 = vbcast.lane.b32.xlu1 %v406_v52, 280 }
 0x30a   : > { %v413_v53 = vpop.permute.xlu1 %412  ;;  %v409_v54 = vpop.permute.xlu0 %408 }
 0x30b   : > { %v424_v55 = vmul.f32 %v413_v53, %v882_v5  ;;  %v425_v56 = vmul.f32 %v413_v53, %v884_v6  ;;  %v422_v57 = vmul.f32 %v409_v54, %v872_v0  ;;  %v423_v58 = vmul.f32 %v409_v54, %v874_v1 }
 0x30d   : > { %432 = vst [vmem:[%s188_s27 + $0x10] sm:$0xff] %v424_v55  ;;  %433 = vst [vmem:[%s188_s27 + $0x18] sm:$0xff] %v425_v56 }
 0x30e   : > { %430 = vst [vmem:[%s188_s27] sm:$0xff] %v422_v57  ;;  %431 = vst [vmem:[%s188_s27 + $0x8] sm:$0xff] %v423_v58  ;;  %v417_v59 = vpop.permute.xlu1 %416 }
 0x30f   : > { %v426_v60 = vmul.f32 %v417_v59, %v876_v2  ;;  %v427_v61 = vmul.f32 %v417_v59, %v880_v4 }
 0x311   : > { %434 = vst [vmem:[%s188_s27 + $0x20] sm:$0xff] %v426_v60  ;;  %435 = vst [vmem:[%s188_s27 + $0x28] sm:$0xff] %v427_v61 }
 0x312   : > { %v421_v62 = vpop.permute.xlu1 %420 }
 0x313   : > { %v428_v63 = vmul.f32 %v421_v62, %v888_v8  ;;  %v429_v0 = vmul.f32 %v421_v62, %v890_v9 }
 0x315   : > { %436 = vst [vmem:[%s188_s27 + $0x30] sm:$0xff] %v428_v63  ;;  %437 = vst [vmem:[%s188_s27 + $0x38] sm:$0xff] %v429_v0 }
 0x316   : > { %674 = shalt.err (!%p671_p2)
}
 0x317   : > { %s675_s7 = scalar_lea.hbm %s925_s10, 1024  ;;  %s679_s19 = scalar_lea.hbm %s974_s3, 2048 }
 0x318   : > { %p676_p4 = scmp.ne.s32.totalorder %s925_s10, %s675_s7  ;;  %p680_p9 = scmp.lt.u32.totalorder %s925_s10, %s974_s3 }
 0x319   : > { %p681_p1 = scmp.lt.u32.totalorder %s679_s19, %s675_s7  ;;  %p683_p6 = scmp.lt.u32.totalorder %s675_s7, %s925_s10 }
 0x31a   : > { %p677_p5 = pnand %p676_p4, %p981_p11 }
 0x31b   : > { %p682_p3 = por %p681_p1, %p680_p9 }
 0x31c   : > { %p678_p7 = pneg %p677_p5 }
 0x31d   : > { %p684_p12 = por %p683_p6, %p682_p3 }
 0x31f   : > { %p685_p13 = pnand %p684_p12, %p678_p7 }
 0x321   : > { %688 = shalt.err (!%p685_p13)
}
 0x322   : > { %s736_s26 = smov 256   ;;  %s737_s27 = smov 16  }
 0x323   : > { %576 = dma.vmem_to_hbm [thread:$0]  (%p981_p11), %s920_s28, 1024, %s925_s10, %s439_s16, %s736_s26, %s736_s26, %s737_s27  }
 0x324 PF: > { %s467_s29 = sand.u32 1, %s715_s12   ;;  %p982_p8 = scmp.ne.s32.totalorder %s979_s25, 0 }
 0x325   : > { %p983_p10 = scmp.ge.s32.totalorder %s727_s15, 2  ;;  %s468_s30 = scalar_lea.sflag [#allocation4], %s467_s29 }
 0x327   : > { %p583_p0 = pnand %p983_p10, %p982_p8 }
 0x329   : > { %710 = dma.done.wait (!%p583_p0), %s468_s30, 1024  }
 0x32a   : > { %712 = vsyncadd (!%p583_p0), %s468_s30, 4294966272  ;;  %p16_p2 = scmp.ge.s32.totalorder %s783_s18, 4   ;;  %s984_s12 = smov %s719_s13 }
 0x32b   : > { %s985_s13 = smov %s723_s14  ;;  %s986_s14 = smov %s795_s21 }
 0x32c   : > { %s987_s15 = smov %s783_s18  ;;  %18 = sbr.rel (!%p16_p2) target bundleno = 5 (0x5), region = 77 }
 0x333   :  { %473 = vsyncpa [#allocation3], 1 }
 0x334   :  { %475 = vsyncpa [#allocation3 + $0x1], 1 }
 0x335   :  { %476 = vsyncpa [#allocation4], 1 }
 0x336   :  { %478 = vsyncpa [#allocation4 + $0x1], 1 }

</bundles_post_ra>
